<compile_context>
chip_gen: v7x
topology: tpu7x:2x2x1
jax: 0.10.0
libtpu: 0.0.40
codegen_flags: <defaults>
</compile_context>

<pallas_src>
import functools
import math

import jax
import jax.numpy as jnp
from jax.experimental import pallas as pl
from jax.experimental.pallas import tpu as pltpu

LANES = 128
MAX_TILE_R = 1024      # (1024, 128) f32 block = 512 KiB; ~86% of HBM BW on v6e
VMEM_LIMIT = 32 << 20  # explicit, safe on v5e/v6e/v7x


def _round_up(x, m):
    return ((x + m - 1) // m) * m


def _focal_terms(x, t, gamma, alpha):
    """Elementwise quality-focal-loss terms in f32. gamma/alpha are trace-time."""
    # Shared transcendental: e = exp(-|x|) feeds both softplus and sigmoid.
    e = jnp.exp(-jnp.abs(x))
    softplus = jnp.log1p(e)                              # log(1 + exp(-|x|))
    bce = jnp.maximum(x, 0.0) - x * t + softplus         # BCE-with-logits (stable)
    p = jnp.where(x >= 0, 1.0, e) / (1.0 + e)            # sigmoid(x), one divide
    alpha_factor = t * alpha + (1.0 - t) * (1.0 - alpha)
    d = jnp.abs(t - p)
    if gamma == 1.5:          # default: avoid exp(gamma*log(d)) (2 EUP ops -> 1)
        mod = d * jnp.sqrt(d)
    elif gamma == 2.0:
        mod = d * d
    elif gamma == 1.0:
        mod = d
    elif gamma == 0.0:
        mod = jnp.ones_like(d)
    else:
        mod = d ** gamma
    return bce * alpha_factor * mod


def _masked_loss(pred_ref, true_ref, gamma, alpha, tile_r, total, need_mask):
    x = pred_ref[...].astype(jnp.float32)
    t = true_ref[...].astype(jnp.float32)
    loss = _focal_terms(x, t, gamma, alpha)
    if need_mask:  # zero out padding elements (static trace-time branch)
        i = pl.program_id(0)
        row = jax.lax.broadcasted_iota(jnp.int32, (tile_r, LANES), 0)
        lane = jax.lax.broadcasted_iota(jnp.int32, (tile_r, LANES), 1)
        idx = (i * tile_r + row) * LANES + lane
        loss = jnp.where(idx < total, loss, 0.0)
    return loss


def _qfocal_partial_kernel(pred_ref, true_ref, out_ref, *, gamma, alpha,
                           tile_r, total, need_mask):
    """Per-block partial sums, kept vreg-shaped (1,8,128): pure VPU adds."""
    loss = _masked_loss(pred_ref, true_ref, gamma, alpha, tile_r, total, need_mask)
    out_ref[...] = loss.reshape(tile_r // 8, 8, LANES).sum(axis=0, keepdims=True)


def _qfocal_elemwise_kernel(pred_ref, true_ref, out_ref, *, gamma, alpha):
    x = pred_ref[...].astype(jnp.float32)
    t = true_ref[...].astype(jnp.float32)
    out_ref[...] = _focal_terms(x, t, gamma, alpha).astype(out_ref.dtype)


def qfocal_loss(pred, true, *, gamma=1.5, alpha=0.25, reduction="mean"):
    """QFocalLoss forward. pred/true: float arrays of identical shape (e.g. NCHW)."""
    assert pred.shape == true.shape
    orig_shape = pred.shape
    total = math.prod(orig_shape)

    rows = pl.cdiv(total, LANES)
    tile_r = min(MAX_TILE_R, _round_up(rows, 8))
    rows_padded = _round_up(rows, tile_r)
    padded_total = rows_padded * LANES
    need_pad = padded_total != total

    flat_p = pred.reshape(-1)
    flat_t = true.reshape(-1)
    if need_pad:
        flat_p = jnp.pad(flat_p, (0, padded_total - total))
        flat_t = jnp.pad(flat_t, (0, padded_total - total))
    pred2d = flat_p.reshape(rows_padded, LANES)
    true2d = flat_t.reshape(rows_padded, LANES)

    num_blocks = rows_padded // tile_r
    grid = (num_blocks,)
    in_specs = [
        pl.BlockSpec((tile_r, LANES), lambda i: (i, 0)),
        pl.BlockSpec((tile_r, LANES), lambda i: (i, 0)),
    ]
    cparams = pltpu.CompilerParams(dimension_semantics=("parallel",),
                                   vmem_limit_bytes=VMEM_LIMIT)

    if reduction in ("mean", "sum"):
        kernel = functools.partial(
            _qfocal_partial_kernel, gamma=gamma, alpha=alpha,
            tile_r=tile_r, total=total, need_mask=need_pad)
        partials = pl.pallas_call(
            kernel,
            out_shape=jax.ShapeDtypeStruct((num_blocks, 8, LANES), jnp.float32),
            grid_spec=pltpu.PrefetchScalarGridSpec(
                num_scalar_prefetch=0,
                grid=grid,
                in_specs=in_specs,
                out_specs=pl.BlockSpec((1, 8, LANES), lambda i: (i, 0, 0)),
            ),
            compiler_params=cparams,
        )(pred2d, true2d)
        s = jnp.sum(partials)          # tiny final reduce outside the kernel
        if reduction == "mean":
            return s / total
        return s
    else:  # 'none'
        kernel = functools.partial(_qfocal_elemwise_kernel, gamma=gamma, alpha=alpha)
        out = pl.pallas_call(
            kernel,
            out_shape=jax.ShapeDtypeStruct((rows_padded, LANES), pred.dtype),
            grid_spec=pltpu.PrefetchScalarGridSpec(
                num_scalar_prefetch=0,
                grid=grid,
                in_specs=in_specs,
                out_specs=pl.BlockSpec((tile_r, LANES), lambda i: (i, 0)),
            ),
            compiler_params=cparams,
        )(pred2d, true2d)
        return out.reshape(-1)[:total].reshape(orig_shape)


def qfocal_loss_ref(pred, true, *, gamma=1.5, alpha=0.25, reduction="mean"):
    x = pred.astype(jnp.float32)
    t = true.astype(jnp.float32)
    bce = jnp.maximum(x, 0.0) - x * t + jnp.log1p(jnp.exp(-jnp.abs(x)))
    p = jax.nn.sigmoid(x)
    loss = bce * (t * alpha + (1 - t) * (1 - alpha)) * jnp.abs(t - p) ** gamma
    if reduction == "mean":
        return loss.mean()
    if reduction == "sum":
        return loss.sum()
    return loss


if __name__ == "__main__":
    key = jax.random.PRNGKey(0)
    k1, k2, k3, k4 = jax.random.split(key, 4)

    ok = True

    # NCHW logits and soft targets (quality focal loss uses soft labels in [0,1]).
    shape = (2, 4, 16, 16)
    pred = jax.random.normal(k1, shape, dtype=jnp.float32) * 2.0
    true = jax.random.uniform(k2, shape, dtype=jnp.float32)
    for red in ("mean", "sum", "none"):
        got = jax.block_until_ready(qfocal_loss(pred, true, reduction=red))
        want = qfocal_loss_ref(pred, true, reduction=red)
        if not jnp.allclose(got, want, rtol=1e-5, atol=1e-5):
            ok = False

    # Non-128-aligned shape: exercises the padding + in-kernel masking path.
    shape2 = (3, 5, 7, 11)
    pred2 = jax.random.normal(k3, shape2, dtype=jnp.float32) * 2.0
    true2 = jax.random.uniform(k4, shape2, dtype=jnp.float32)
    for red in ("mean", "sum", "none"):
        got = jax.block_until_ready(qfocal_loss(pred2, true2, reduction=red))
        want = qfocal_loss_ref(pred2, true2, reduction=red)
        if not jnp.allclose(got, want, rtol=1e-5, atol=1e-5):
            ok = False

    if ok:
        print("KERNEL_OK")
</pallas_src>

<mosaic_0001>
module attributes {stable_mosaic.version = 11 : i64} {
  func.func @_qfocal_partial_kernel(%arg0: i32, %arg1: memref<16x128xf32, #tpu.memory_space<vmem>>, %arg2: memref<16x128xf32, #tpu.memory_space<vmem>>, %arg3: memref<1x8x128xf32, #tpu.memory_space<vmem>>) attributes {dimension_semantics = [#tpu.dimension_semantics<parallel>], iteration_bounds = array<i64: 1>, scalar_prefetch = 0 : i64, scratch_operands = 0 : i64, tpu.core_type = #tpu.core_type<tc>, window_params = [{transform_indices = @transform_0, window_bounds = array<i64: 16, 128>}, {transform_indices = @transform_1, window_bounds = array<i64: 16, 128>}, {transform_indices = @transform_2, window_bounds = array<i64: 1, 8, 128>}]} {
    %c0 = arith.constant 0 : index
    %c0_0 = arith.constant 0 : index
    %0 = vector.load %arg1[%c0, %c0_0] : memref<16x128xf32, #tpu.memory_space<vmem>>, vector<16x128xf32>
    %c0_1 = arith.constant 0 : index
    %c0_2 = arith.constant 0 : index
    %1 = vector.load %arg2[%c0_1, %c0_2] : memref<16x128xf32, #tpu.memory_space<vmem>>, vector<16x128xf32>
    %2 = math.absf %0 : vector<16x128xf32>
    %cst = arith.constant 0.000000e+00 : f32
    %3 = vector.broadcast %cst : f32 to vector<16x128xf32>
    %4 = arith.subf %3, %2 : vector<16x128xf32>
    %5 = math.exp %4 : vector<16x128xf32>
    %6 = math.log1p %5 : vector<16x128xf32>
    %cst_3 = arith.constant 0.000000e+00 : f32
    %7 = vector.broadcast %cst_3 : f32 to vector<16x128xf32>
    %8 = arith.maximumf %0, %7 : vector<16x128xf32>
    %9 = arith.mulf %0, %1 : vector<16x128xf32>
    %10 = arith.subf %8, %9 : vector<16x128xf32>
    %11 = arith.addf %10, %6 : vector<16x128xf32>
    %cst_4 = arith.constant 0.000000e+00 : f32
    %12 = vector.broadcast %cst_4 : f32 to vector<16x128xf32>
    %13 = arith.cmpf oge, %0, %12 : vector<16x128xf32>
    %cst_5 = arith.constant 1.000000e+00 : f32
    %14 = vector.broadcast %cst_5 : f32 to vector<16x128xf32>
    %15 = arith.select %13, %14, %5 : vector<16x128xi1>, vector<16x128xf32>
    %cst_6 = arith.constant 1.000000e+00 : f32
    %16 = vector.broadcast %cst_6 : f32 to vector<16x128xf32>
    %17 = arith.addf %16, %5 : vector<16x128xf32>
    %18 = arith.divf %15, %17 : vector<16x128xf32>
    %cst_7 = arith.constant 2.500000e-01 : f32
    %19 = vector.broadcast %cst_7 : f32 to vector<16x128xf32>
    %20 = arith.mulf %1, %19 : vector<16x128xf32>
    %cst_8 = arith.constant 1.000000e+00 : f32
    %21 = vector.broadcast %cst_8 : f32 to vector<16x128xf32>
    %22 = arith.subf %21, %1 : vector<16x128xf32>
    %cst_9 = arith.constant 7.500000e-01 : f32
    %23 = vector.broadcast %cst_9 : f32 to vector<16x128xf32>
    %24 = arith.mulf %22, %23 : vector<16x128xf32>
    %25 = arith.addf %20, %24 : vector<16x128xf32>
    %26 = arith.subf %1, %18 : vector<16x128xf32>
    %27 = math.absf %26 : vector<16x128xf32>
    %28 = math.sqrt %27 : vector<16x128xf32>
    %29 = arith.mulf %27, %28 : vector<16x128xf32>
    %30 = arith.mulf %11, %25 : vector<16x128xf32>
    %31 = arith.mulf %30, %29 : vector<16x128xf32>
    %32 = vector.shape_cast %31 : vector<16x128xf32> to vector<2x8x128xf32>
    %cst_10 = arith.constant dense<0.000000e+00> : vector<8x128xf32>
    %33 = vector.multi_reduction <add>, %32, %cst_10 [0] : vector<2x8x128xf32> to vector<8x128xf32>
    %34 = vector.shape_cast %33 : vector<8x128xf32> to vector<1x8x128xf32>
    %c0_11 = arith.constant 0 : index
    %c0_12 = arith.constant 0 : index
    %c0_13 = arith.constant 0 : index
    %35 = vector.load %arg3[%c0_11, %c0_12, %c0_13] : memref<1x8x128xf32, #tpu.memory_space<vmem>>, vector<1x8x128xf32>
    tpu.vector_store %arg3[%c0_11, %c0_12, %c0_13], %34 {strides = array<i32>} : memref<1x8x128xf32, #tpu.memory_space<vmem>>, vector<1x8x128xf32>,
    return
  }
  func.func @transform_0(%arg0: i32) -> (i32, i32) {
    %c0_i32 = arith.constant 0 : i32
    %c0_i32_0 = arith.constant 0 : i32
    return %arg0, %c0_i32 : i32, i32
  }
  func.func @transform_1(%arg0: i32) -> (i32, i32) {
    %c0_i32 = arith.constant 0 : i32
    %c0_i32_0 = arith.constant 0 : i32
    return %arg0, %c0_i32 : i32, i32
  }
  func.func @transform_2(%arg0: i32) -> (i32, i32, i32) {
    %c0_i32 = arith.constant 0 : i32
    %c0_i32_0 = arith.constant 0 : i32
    %c0_i32_1 = arith.constant 0 : i32
    return %arg0, %c0_i32, %c0_i32_0 : i32, i32, i32
  }
}

</mosaic_0001>

<bundles_post_ra>
// kernel: tpu_custom_call.1
= control target key start
LH: loop header
LB: loop body
LE: loop exit
PB: predicated region body
PF: predicated region fallthrough
CT: control target
= control target key end

     0   :  { %7 = vsyncpa [#allocation3], 0  ;;  %s287_s0 = inlined_call_operand.hbm [shape: f32[16,128], index: 0, kind: input, shape index: {}]   ;;  %s288_s1 = inlined_call_operand.hbm [shape: f32[16,128], index: 1, kind: input, shape index: {}]   ;;  %s289_s2 = inlined_call_operand.hbm [shape: f32[1,8,128], index: 2, kind: output, shape index: {}]  }
   0x1   :  { %8 = vsyncpa [#allocation6], 0 }
   0x2   :  { %9 = vsyncpa [#allocation4], 0  ;;  %s231_s9 = smov [#allocation2]   ;;  %s159_s13 = scalar_lea.hbm %s287_s0, 256 }
   0x3   :  { %s15_s10 = sshll.u32 %s231_s9, 4  ;;  %p160_p0 = scmp.ne.s32.totalorder %s287_s0, %s159_s13  ;;  %s16_s10 = int_to_ptr.vmem [resolvable:$true] %s15_s10 }
   0x4   :  { %p163_p1 = scmp.lt.u32.totalorder %s159_s13, %s287_s0 }
   0x6   :  { %p165_p2 = pnand %p163_p1, %p160_p0 }
   0x8   :  { %168 = shalt.err (!%p165_p2)
}
   0x9   :  { %s169_s18 = scalar_lea.vmem %s16_s10, 256  ;;  %p174_p4 = scmp.lt.s32.totalorder %s16_s10, %s16_s10 }
   0xa   :  { %p170_p3 = scmp.ne.s32.totalorder %s16_s10, %s169_s18  ;;  %p175_p5 = scmp.lt.s32.totalorder %s169_s18, %s169_s18 }
   0xc   :  { %p176_p6 = por %p175_p5, %p174_p4 }
   0xe   :  { %p177_p7 = pnand %p176_p6, %p170_p3 }
  0x10   :  { %180 = shalt.err (!%p177_p7)
}
  0x11   :  { %s232_s19 = smov 128   ;;  %s233_s20 = smov 8  }
  0x12   :  { %21 = dma.hbm_to_vmem [thread:$0]  %s287_s0, 256, %s16_s10, [#allocation3], %s232_s19, %s232_s19, %s233_s20  }
  0x13   :  { %s234_s23 = smov [#allocation5]   ;;  %s181_s27 = scalar_lea.hbm %s288_s1, 256 }
  0x14   :  { %s27_s24 = sshll.u32 %s234_s23, 4  ;;  %p182_p8 = scmp.ne.s32.totalorder %s288_s1, %s181_s27  ;;  %s28_s24 = int_to_ptr.vmem [resolvable:$true] %s27_s24 }
  0x15   :  { %p185_p9 = scmp.lt.u32.totalorder %s181_s27, %s288_s1 }
  0x17   :  { %p187_p10 = pnand %p185_p9, %p182_p8 }
  0x19   :  { %190 = shalt.err (!%p187_p10)
}
  0x1a   :  { %s191_s4 = scalar_lea.vmem %s28_s24, 256  ;;  %p196_p12 = scmp.lt.s32.totalorder %s28_s24, %s28_s24 }
  0x1b   :  { %p192_p11 = scmp.ne.s32.totalorder %s28_s24, %s191_s4  ;;  %p197_p13 = scmp.lt.s32.totalorder %s191_s4, %s191_s4 }
  0x1d   :  { %p198_p0 = por %p197_p13, %p196_p12 }
  0x1f   :  { %p199_p1 = pnand %p198_p0, %p192_p11 }
  0x21   :  { %202 = shalt.err (!%p199_p1)
}
  0x22   :  { %33 = dma.hbm_to_vmem [thread:$0]  %s288_s1, 256, %s28_s24, [#allocation6], %s232_s19, %s232_s19, %s233_s20  }
  0x23   :  { %225 = dma.done.wait [#allocation3], 256  }
  0x24   :  { %226 = vsyncadd [#allocation3], 4294967040 }
  0x25   :  { %227 = dma.done.wait [#allocation6], 256  }
  0x26   :  { %228 = vsyncadd [#allocation6], 4294967040  ;;  %v40_v0 = vld [vmem:[#allocation2] sm:$0xff]  ;;  %v41_v1 = vld [vmem:[#allocation2 + $0x8] sm:$0xff]  ;;  %s235_s1 = smov [#allocation7]  }
  0x27   :  { %v44_v2 = vand.u32 2147483647, %v40_v0  ;;  %v45_v3 = vand.u32 2147483647, %v41_v1  ;;  %vm78_vm0 = vcmp.ge.f32.partialorder %v40_v0, 0.0  ;;  %vm79_vm1 = vcmp.ge.f32.partialorder %v41_v1, 0.0 }
  0x28   :  { %v42_v15 = vld [vmem:[#allocation5] sm:$0xff]  ;;  %v43_v17 = vld [vmem:[#allocation5 + $0x8] sm:$0xff]  ;;  %v70_v32 = vmax.f32 %v40_v0, 0.0  ;;  %v71_v33 = vmax.f32 %v41_v1, 0.0  ;;  %s128_s6 = sshll.u32 %s235_s1, 4  ;;  %s129_s6 = int_to_ptr.vmem [resolvable:$true] %s128_s6 }
  0x29   :  { %v46_v4 = vsub.f32 0.0, %v44_v2  ;;  %v47_v5 = vsub.f32 0.0, %v45_v3  ;;  %v72_v34 = vmul.f32 %v42_v15, %v40_v0  ;;  %v90_v35 = vsub.f32 1.0, %v42_v15  ;;  %s203_s7 = scalar_lea.vmem %s129_s6, 128  ;;  %p208_p3 = scmp.lt.s32.totalorder %s129_s6, %s129_s6 }
  0x2a   :  { %v73_v38 = vmul.f32 %v43_v17, %v41_v1  ;;  %v91_v39 = vsub.f32 1.0, %v43_v17  ;;  %v88_v43 = vmul.f32 0.25, %v42_v15  ;;  %v89_v47 = vmul.f32 0.25, %v43_v17  ;;  %p204_p2 = scmp.ne.s32.totalorder %s129_s6, %s203_s7  ;;  %p209_p4 = scmp.lt.s32.totalorder %s203_s7, %s203_s7 }
  0x2b   :  { %v48_v6 = vmul.f32 1.442695, %v46_v4  ;;  %v50_v7 = vmul.f32 1.442695, %v47_v5  ;;  %v74_v42 = vsub.f32 %v70_v32, %v72_v34  ;;  %v92_v44 = vmul.f32 0.75, %v90_v35 }
  0x2c   :  { %v75_v46 = vsub.f32 %v71_v33, %v73_v38  ;;  %v93_v48 = vmul.f32 0.75, %v91_v39  ;;  %p210_p5 = por %p209_p4, %p208_p3 }
  0x2d   :  { %143 = vpow2.f32 %v48_v6  ;;  %v94_v51 = vadd.f32 %v92_v44, %v88_v43 }
  0x2e   :  { %145 = vpow2.f32 %v50_v7  ;;  %v95_v54 = vadd.f32 %v93_v48, %v89_v47  ;;  %p211_p6 = pnand %p210_p5, %p204_p2 }
  0x37   :  { %v144_v8 = vpop.eup %143 }
  0x38   :  { %v146_v9 = vpop.eup %145  ;;  %v52_v10 = vadd.f32 1.0, %v144_v8  ;;  %v80_v12 = vsel %vm78_vm0, 1.0, %v144_v8  ;;  %v55_v18 = vmul.f32 -0.5, %v144_v8  ;;  %v58_v27 = vand.u32 2147483647, %v144_v8 }
  0x39   :  { %v61_v11 = vadd.f32 1.0, %v146_v9  ;;  %v81_v13 = vsel %vm79_vm1, 1.0, %v146_v9  ;;  %v64_v20 = vmul.f32 -0.5, %v146_v9  ;;  %v67_v31 = vand.u32 2147483647, %v146_v9 }
  0x3a   :  { %147 = vrcp.f32 %v52_v10  ;;  %v56_v24 = vadd.f32 1.0, %v55_v18  ;;  %vm59_vm2 = vcmp.lt.f32.partialorder %v58_v27, 0.0004427343 }
  0x3b   :  { %149 = vrcp.f32 %v61_v11  ;;  %v65_v28 = vadd.f32 1.0, %v64_v20  ;;  %vm68_vm3 = vcmp.lt.f32.partialorder %v67_v31, 0.0004427343 }
  0x3c   :  { %151 = vlog2.f32 %v52_v10  ;;  %v57_v37 = vmul.f32 %v144_v8, %v56_v24 }
  0x3d   :  { %153 = vlog2.f32 %v61_v11  ;;  %v66_v41 = vmul.f32 %v146_v9, %v65_v28 }
  0x44   :  { %v148_v14 = vpop.eup %147 }
  0x45   :  { %v150_v16 = vpop.eup %149  ;;  %v85_v19 = vmul.f32 %v148_v14, %v80_v12 }
  0x46   :  { %v87_v21 = vmul.f32 %v150_v16, %v81_v13  ;;  %v152_v26 = vpop.eup %151 }
  0x47   :  { %v96_v22 = vsub.f32 %v42_v15, %v85_v19  ;;  %v154_v30 = vpop.eup %153  ;;  %v54_v36 = vmul.f32 0.6931472, %v152_v26 }
  0x48   :  { %v97_v23 = vsub.f32 %v43_v17, %v87_v21  ;;  %v63_v40 = vmul.f32 0.6931472, %v154_v30 }
  0x49   :  { %v98_v25 = vand.u32 2147483647, %v96_v22  ;;  %v60_v45 = vsel %vm59_vm2, %v57_v37, %v54_v36 }
  0x4a   :  { %v99_v29 = vand.u32 2147483647, %v97_v23  ;;  %v69_v49 = vsel %vm68_vm3, %v66_v41, %v63_v40  ;;  %v76_v50 = vadd.f32 %v74_v42, %v60_v45 }
  0x4b   :  { %155 = vrsqrt.f32 %v98_v25  ;;  %v77_v53 = vadd.f32 %v75_v46, %v69_v49  ;;  %vm102_vm4 = vcmp.eq.f32.partialorder %v98_v25, inf  ;;  %v105_v55 = vand.u32 2147483648, %v98_v25 }
  0x4c   :  { %157 = vrsqrt.f32 %v99_v29  ;;  %vm104_vm5 = vcmp.eq.f32.partialorder %v98_v25, 0.0  ;;  %vm109_vm6 = vcmp.eq.f32.partialorder %v99_v29, inf  ;;  %v112_v58 = vand.u32 2147483648, %v99_v29 }
  0x4d   :  { %vm111_vm7 = vcmp.eq.f32.partialorder %v99_v29, 0.0  ;;  %v116_v61 = vmul.f32 %v94_v51, %v76_v50  ;;  %v117_v0 = vmul.f32 %v95_v54, %v77_v53 }
  0x55   :  { %v156_v52 = vpop.eup %155 }
  0x56   :  { %v158_v56 = vpop.eup %157  ;;  %v101_v57 = vmul.f32 %v156_v52, %v98_v25 }
  0x57   :  { %v108_v59 = vmul.f32 %v158_v56, %v99_v29 }
  0x58   :  { %v103_v60 = vsel %vm102_vm4, %v98_v25, %v101_v57 }
  0x59   :  { %v106_v62 = vsel %vm104_vm5, %v105_v55, %v103_v60  ;;  %v110_v63 = vsel %vm109_vm6, %v99_v29, %v108_v59 }
  0x5a   :  { %v113_v1 = vsel %vm111_vm7, %v112_v58, %v110_v63  ;;  %v114_v2 = vmul.f32 %v106_v62, %v98_v25 }
  0x5b   :  { %v115_v3 = vmul.f32 %v113_v1, %v99_v29 }
  0x5c   :  { %v118_v4 = vmul.f32 %v116_v61, %v114_v2 }
  0x5d   :  { %v119_v5 = vmul.f32 %v117_v0, %v115_v3 }
  0x5f   :  { %v120_v6 = vadd.f32 %v119_v5, %v118_v4 }
  0x61   :  { %121 = vst [vmem:[#allocation7] sm:$0xff] %v120_v6 }
  0x62   :  { %214 = shalt.err (!%p211_p6)
}
  0x63   :  { %s215_s10 = scalar_lea.hbm %s289_s2, 128 }
  0x64   :  { %p216_p7 = scmp.ne.s32.totalorder %s289_s2, %s215_s10  ;;  %p219_p8 = scmp.lt.u32.totalorder %s215_s10, %s289_s2 }
  0x66   :  { %p221_p9 = pnand %p219_p8, %p216_p7 }
  0x68   :  { %224 = shalt.err (!%p221_p9)
}
  0x69   :  { %131 = dma.vmem_to_hbm [thread:$0]  %s129_s6, 128, %s289_s2, [#allocation4]  }
  0x6a   :  { %229 = dma.done.wait [#allocation4], 128  }
  0x6b   :  { %230 = vsyncadd [#allocation4], 4294967168 }
  0x6c   :  { %135 = vsyncpa [#allocation3], 1 }
  0x6d   :  { %136 = vsyncpa [#allocation6], 1 }
  0x6e   :  { %137 = vsyncpa [#allocation4], 1 }

</bundles_post_ra>
